<compile_context>
chip_gen: v5e
topology: v5e:2x2
jax: 0.10.0
libtpu: 0.0.40
codegen_flags: <defaults>
</compile_context>

<pallas_src>
import functools

import jax
import jax.numpy as jnp
from jax import lax
from jax.experimental import pallas as pl
from jax.experimental.pallas import tpu as pltpu


def _chamfer_kernel(a1_ref, a2_ref, out_ref, colmin_ref, rowsum_ref, *,
                    n1, n2, batch, tb, tn2, use_mxu):
    j = pl.program_id(1)
    n2_steps = pl.num_programs(1)

    @pl.when(j == 0)
    def _init():
        colmin_ref[...] = jnp.full(colmin_ref.shape, jnp.inf, colmin_ref.dtype)
        rowsum_ref[...] = jnp.zeros(rowsum_ref.shape, rowsum_ref.dtype)

    a1 = a1_ref[...].astype(jnp.float32)            # (TB, F, N1)
    a2 = a2_ref[...].astype(jnp.float32)            # (TB, TN2, F)

    ragged_rows = (n2 % tn2) != 0                   # static python bool
    if ragged_rows:
        row_ids = j * tn2 + lax.broadcasted_iota(jnp.int32, (1, tn2, 1), 1)
        rows_ok = row_ids < n2                      # (1, TN2, 1)

    if use_mxu:
        # ||.||^2 decomposition with reassociated epilogue.
        sq1 = jnp.sum(a1 * a1, axis=1)              # (TB, N1)
        sq2 = jnp.sum(a2 * a2, axis=2)              # (TB, TN2)
        cross2 = lax.dot_general(                   # (TB, TN2, N1) = (2*a2) @ a1
            a2 + a2, a1,
            dimension_numbers=(((2,), (1,)), ((0,), (0,))),
            preferred_element_type=jnp.float32,
            precision=lax.Precision.HIGHEST)
        t1 = sq1[:, None, :] - cross2                               # row mins
        row_val = jnp.maximum(jnp.min(t1, axis=2) + sq2, 0.0)       # (TB, TN2)
        t2 = sq2[:, :, None] - cross2                               # col mins
        if ragged_rows:
            t2 = jnp.where(rows_ok, t2, jnp.inf)
            row_val = jnp.where(rows_ok[:, :, 0], row_val, 0.0)
        tile_colmin = jnp.min(t2, axis=1)                           # (TB, N1)
    else:
        # Exact per-feature squared differences (F in {1, 2}).
        f = a1.shape[1]
        d = None
        for k in range(f):                          # static, tiny unroll
            diff = a2[:, :, k:k + 1] - a1[:, k:k + 1, :]            # (TB,TN2,N1)
            d = diff * diff if d is None else d + diff * diff
        row_val = jnp.min(d, axis=2)                                # (TB, TN2)
        if ragged_rows:
            d = jnp.where(rows_ok, d, jnp.inf)
            row_val = jnp.where(rows_ok[:, :, 0], row_val, 0.0)
        tile_colmin = jnp.min(d, axis=1)                            # (TB, N1)

    rowsum_ref[...] += jnp.sum(row_val, axis=1, keepdims=True)      # (TB, 1)
    colmin_ref[...] = jnp.minimum(colmin_ref[...], tile_colmin)     # (TB, N1)

    @pl.when(j == n2_steps - 1)
    def _finalize():
        av1 = rowsum_ref[...] * (1.0 / n2)                          # (TB, 1)
        if use_mxu:
            col_val = jnp.maximum(colmin_ref[...] + sq1, 0.0)       # clamp after min
        else:
            col_val = colmin_ref[...]
        av2 = jnp.sum(col_val, axis=1, keepdims=True) * (1.0 / n1)  # (TB, 1)
        val = 0.5 * (av1 + av2)                                     # (TB, 1)
        if (batch % tb) != 0:                                       # static
            b_ids = (pl.program_id(0) * tb
                     + lax.broadcasted_iota(jnp.int32, (tb, 1), 0))
            val = jnp.where(b_ids < batch, val, 0.0)
        out_ref[...] = val[None]                                    # (1, TB, 1)


def _round_up(x, m):
    return ((x + m - 1) // m) * m


def _vmem_capacity_bytes():
    try:
        cap = int(pltpu.get_tpu_info().vmem_capacity_bytes)
        if cap > 0:
            return cap
    except Exception:
        pass
    return 64 * 1024 * 1024          # conservative fallback (v7x-sized)


def _plan_tiles(B, N1, N2, f_store, budget):
    """Pick (TB, TN2) using the *padded* VMEM layout (sublane x 128-lane)."""
    n1l = _round_up(N1, 128)
    f_sub = _round_up(f_store, 8)
    f_lane = _round_up(f_store, 128)

    def fits(tb, tn2):
        tn2s = _round_up(tn2, 8)
        a1_buf = f_sub * n1l * 4                 # (F, N1) block per batch element
        a2_buf = tn2s * f_lane * 4               # (TN2, F) block per batch element
        temps = 3 * tn2s * n1l * 4               # cross/t1/t2 (or d/diff) live tiles
        colmin = n1l * 4                         # running column-min row
        per_elem = 2 * a1_buf + 2 * a2_buf + temps + colmin   # x2: double buffering
        fixed = 8 * n1l * 4 + (64 << 10)         # sublane-pad slack + misc
        return tb * per_elem + fixed <= budget

    if fits(1, N2):
        tn2 = N2
        lo, hi = 1, max(1, min(B, 1024))         # maximize batch elements per step
        while lo < hi:
            mid = (lo + hi + 1) // 2
            if fits(mid, N2):
                lo = mid
            else:
                hi = mid - 1
        tb = lo
    else:
        tb = 1
        lo, hi = 1, max(1, (N2 + 7) // 8)        # largest N2 tile (multiple of 8)
        while lo < hi:
            mid = (lo + hi + 1) // 2
            if fits(1, mid * 8):
                lo = mid
            else:
                hi = mid - 1
        # TODO(synk): also tile N1 for clouds so large that even an 8-row N2
        # tile does not fit (N1 >~ 300k on v7x).
        tn2 = min(N2, lo * 8)
    return tb, tn2


def point_loss(array1, array2):
    """Pallas implementation of PointLoss.forward (symmetric Chamfer * 100)."""
    B, N1, F = array1.shape
    B2, N2, F2 = array2.shape
    assert B == B2 and F == F2

    use_mxu = F >= 3                 # exact VPU diff path only for F in {1, 2}
    f_store = _round_up(F, 8) if use_mxu else F

    a1_in = jnp.transpose(array1, (0, 2, 1))         # (B, F, N1): F on sublanes
    a2_in = array2                                   # (B, N2, F)
    if f_store != F:                                 # zero-pad features for the MXU
        a1_in = jnp.pad(a1_in, ((0, 0), (0, f_store - F), (0, 0)))
        a2_in = jnp.pad(a2_in, ((0, 0), (0, 0), (0, f_store - F)))

    cap = _vmem_capacity_bytes()
    budget = max(8 << 20, min(int(cap * 0.45), 96 << 20))
    vmem_limit = max(32 << 20, min(int(cap * 0.70), 110 << 20))

    tb, tn2 = _plan_tiles(B, N1, N2, f_store, budget)
    b_steps = pl.cdiv(B, tb)
    n2_steps = pl.cdiv(N2, tn2)

    kernel = functools.partial(_chamfer_kernel, n1=N1, n2=N2, batch=B,
                               tb=tb, tn2=tn2, use_mxu=use_mxu)

    # TODO(synk): when b_steps < 2 on v7x, add a second "parallel" grid axis
    # over N2 tiles (per-tile partial outputs) so both TensorCores are fed.
    partials = pl.pallas_call(
        kernel,
        out_shape=jax.ShapeDtypeStruct((b_steps, tb, 1), jnp.float32),
        grid_spec=pltpu.PrefetchScalarGridSpec(
            num_scalar_prefetch=0,
            grid=(b_steps, n2_steps),
            in_specs=[
                pl.BlockSpec((tb, f_store, N1), lambda i, j: (i, 0, 0)),
                pl.BlockSpec((tb, tn2, f_store), lambda i, j: (i, j, 0)),
            ],
            out_specs=pl.BlockSpec((1, tb, 1), lambda i, j: (i, 0, 0)),
            scratch_shapes=[
                pltpu.VMEM((tb, N1), jnp.float32),   # running column-min
                pltpu.VMEM((tb, 1), jnp.float32),    # running row-min sum
            ],
        ),
        compiler_params=pltpu.CompilerParams(
            dimension_semantics=("parallel", "arbitrary"),
            vmem_limit_bytes=vmem_limit,
        ),
    )(a1_in, a2_in)

    # Padded batch entries are zeroed in-kernel; single folded scale 100 / B.
    return jnp.sum(partials) * (100.0 / B)


def _point_loss_ref(array1, array2):
    """Pure-JAX reference mirroring the PyTorch code (exact differences)."""
    a1 = array1.astype(jnp.float32)
    a2 = array2.astype(jnp.float32)
    d = jnp.sum((a2[:, :, None, :] - a1[:, None, :, :]) ** 2, axis=-1)  # (B,N2,N1)
    av1 = jnp.mean(jnp.min(d, axis=2), axis=1)   # per array2 point, min over array1
    av2 = jnp.mean(jnp.min(d, axis=1), axis=1)   # per array1 point, min over array2
    return 100.0 * jnp.mean(0.5 * (av1 + av2))


if __name__ == "__main__":
    key = jax.random.PRNGKey(0)
    k1, k2 = jax.random.split(key)
    B, N, F = 2, 64, 3  # small point clouds: (batch, num_point, num_features)
    array1 = jax.random.uniform(k1, (B, N, F), dtype=jnp.float32)
    array2 = jax.random.uniform(k2, (B, N, F), dtype=jnp.float32)

    loss = jax.block_until_ready(point_loss(array1, array2))
    ref = jax.block_until_ready(_point_loss_ref(array1, array2))
    assert jnp.allclose(loss, ref, rtol=1e-4, atol=1e-4), (loss, ref)

    # Larger-magnitude coordinates exercise the decomposition's numerics
    # (same shapes -> same compiled kernel, no retrace cost).
    a1b = array1 * 10.0 - 5.0
    a2b = array2 * 10.0 - 5.0
    loss_b = jax.block_until_ready(point_loss(a1b, a2b))
    ref_b = jax.block_until_ready(_point_loss_ref(a1b, a2b))
    assert jnp.allclose(loss_b, ref_b, rtol=1e-4, atol=1e-4), (loss_b, ref_b)

    print("KERNEL_OK")
</pallas_src>

<mosaic_0001>
module attributes {stable_mosaic.version = 11 : i64} {
  func.func @_chamfer_kernel(%arg0: i32, %arg1: i32, %arg2: memref<2x8x64xf32, #tpu.memory_space<vmem>>, %arg3: memref<2x64x8xf32, #tpu.memory_space<vmem>>, %arg4: memref<1x2x1xf32, #tpu.memory_space<vmem>>, %arg5: memref<2x64xf32, #tpu.memory_space<vmem>>, %arg6: memref<2x1xf32, #tpu.memory_space<vmem>>) attributes {dimension_semantics = [#tpu.dimension_semantics<parallel>, #tpu.dimension_semantics<arbitrary>], iteration_bounds = array<i64: 1, 1>, scalar_prefetch = 0 : i64, scratch_operands = 2 : i64, tpu.core_type = #tpu.core_type<tc>, window_params = [{transform_indices = @transform_0, window_bounds = array<i64: 2, 8, 64>}, {transform_indices = @transform_1, window_bounds = array<i64: 2, 64, 8>}, {transform_indices = @transform_2, window_bounds = array<i64: 1, 2, 1>}]} {
    %c0_i32 = arith.constant 0 : i32
    %0 = arith.cmpi eq, %arg1, %c0_i32 : i32
    %1 = arith.extui %0 : i1 to i32
    %c0_i32_0 = arith.constant 0 : i32
    %2 = arith.cmpi ne, %1, %c0_i32_0 : i32
    scf.if %2 {
      %cst_22 = arith.constant 0x7F800000 : f32
      %33 = vector.broadcast %cst_22 : f32 to vector<2x64xf32>
      %c0_23 = arith.constant 0 : index
      %c0_24 = arith.constant 0 : index
      %34 = vector.load %arg5[%c0_23, %c0_24] : memref<2x64xf32, #tpu.memory_space<vmem>>, vector<2x64xf32>
      tpu.vector_store %arg5[%c0_23, %c0_24], %33 {strides = array<i32>} : memref<2x64xf32, #tpu.memory_space<vmem>>, vector<2x64xf32>,
      %cst_25 = arith.constant 0.000000e+00 : f32
      %35 = vector.broadcast %cst_25 : f32 to vector<2x1xf32>
      %c0_26 = arith.constant 0 : index
      %c0_27 = arith.constant 0 : index
      %36 = vector.load %arg6[%c0_26, %c0_27] : memref<2x1xf32, #tpu.memory_space<vmem>>, vector<2x1xf32>
      tpu.vector_store %arg6[%c0_26, %c0_27], %35 {strides = array<i32>} : memref<2x1xf32, #tpu.memory_space<vmem>>, vector<2x1xf32>,
    } else {
    }
    %c0 = arith.constant 0 : index
    %c0_1 = arith.constant 0 : index
    %c0_2 = arith.constant 0 : index
    %3 = vector.load %arg2[%c0, %c0_1, %c0_2] : memref<2x8x64xf32, #tpu.memory_space<vmem>>, vector<2x8x64xf32>
    %c0_3 = arith.constant 0 : index
    %c0_4 = arith.constant 0 : index
    %c0_5 = arith.constant 0 : index
    %4 = vector.load %arg3[%c0_3, %c0_4, %c0_5] : memref<2x64x8xf32, #tpu.memory_space<vmem>>, vector<2x64x8xf32>
    %5 = arith.mulf %3, %3 : vector<2x8x64xf32>
    %cst = arith.constant dense<0.000000e+00> : vector<2x64xf32>
    %6 = vector.multi_reduction <add>, %5, %cst [1] : vector<2x8x64xf32> to vector<2x64xf32>
    %7 = arith.mulf %4, %4 : vector<2x64x8xf32>
    %cst_6 = arith.constant dense<0.000000e+00> : vector<2x64xf32>
    %8 = vector.multi_reduction <add>, %7, %cst_6 [2] : vector<2x64x8xf32> to vector<2x64xf32>
    %9 = arith.addf %4, %4 : vector<2x64x8xf32>
    %cst_7 = arith.constant dense<0.000000e+00> : vector<2x64x64xf32>
    %10 = tpu.matmul %9, %3, %cst_7 {dimension_numbers = #tpu.dot_dimension_numbers<[2], [1], [1], [2], [0, 0, 0, 1, 1, 2], [0], [0]>, precision = #tpu.contract_precision<fp32>} : vector<2x64x8xf32>, vector<2x8x64xf32>, vector<2x64x64xf32> -> vector<2x64x64xf32>
    %11 = vector.shape_cast %6 : vector<2x64xf32> to vector<2x1x64xf32>
    %12 = vector.broadcast %11 : vector<2x1x64xf32> to vector<2x64x64xf32>
    %13 = arith.subf %12, %10 : vector<2x64x64xf32>
    %cst_8 = arith.constant dense<0x7F800000> : vector<2x64xf32>
    %14 = vector.multi_reduction <minimumf>, %13, %cst_8 [2] : vector<2x64x64xf32> to vector<2x64xf32>
    %15 = arith.addf %14, %8 : vector<2x64xf32>
    %cst_9 = arith.constant 0.000000e+00 : f32
    %16 = vector.broadcast %cst_9 : f32 to vector<2x64xf32>
    %17 = arith.maximumf %15, %16 : vector<2x64xf32>
    %18 = vector.shape_cast %8 : vector<2x64xf32> to vector<2x64x1xf32>
    %19 = vector.broadcast %18 : vector<2x64x1xf32> to vector<2x64x64xf32>
    %20 = arith.subf %19, %10 : vector<2x64x64xf32>
    %cst_10 = arith.constant dense<0x7F800000> : vector<2x64xf32>
    %21 = vector.multi_reduction <minimumf>, %20, %cst_10 [1] : vector<2x64x64xf32> to vector<2x64xf32>
    %c0_11 = arith.constant 0 : index
    %c0_12 = arith.constant 0 : index
    %22 = vector.load %arg6[%c0_11, %c0_12] : memref<2x1xf32, #tpu.memory_space<vmem>>, vector<2x1xf32>
    %cst_13 = arith.constant dense<0.000000e+00> : vector<2xf32>
    %23 = vector.multi_reduction <add>, %17, %cst_13 [1] : vector<2x64xf32> to vector<2xf32>
    %24 = vector.shape_cast %23 : vector<2xf32> to vector<2x1xf32>
    %25 = arith.addf %22, %24 : vector<2x1xf32>
    %c0_14 = arith.constant 0 : index
    %c0_15 = arith.constant 0 : index
    %26 = vector.load %arg6[%c0_14, %c0_15] : memref<2x1xf32, #tpu.memory_space<vmem>>, vector<2x1xf32>
    tpu.vector_store %arg6[%c0_14, %c0_15], %25 {strides = array<i32>} : memref<2x1xf32, #tpu.memory_space<vmem>>, vector<2x1xf32>,
    %c0_16 = arith.constant 0 : index
    %c0_17 = arith.constant 0 : index
    %27 = vector.load %arg5[%c0_16, %c0_17] : memref<2x64xf32, #tpu.memory_space<vmem>>, vector<2x64xf32>
    %28 = arith.minimumf %27, %21 : vector<2x64xf32>
    %c0_18 = arith.constant 0 : index
    %c0_19 = arith.constant 0 : index
    %29 = vector.load %arg5[%c0_18, %c0_19] : memref<2x64xf32, #tpu.memory_space<vmem>>, vector<2x64xf32>
    tpu.vector_store %arg5[%c0_18, %c0_19], %28 {strides = array<i32>} : memref<2x64xf32, #tpu.memory_space<vmem>>, vector<2x64xf32>,
    %c0_i32_20 = arith.constant 0 : i32
    %30 = arith.cmpi eq, %arg1, %c0_i32_20 : i32
    %31 = arith.extui %30 : i1 to i32
    %c0_i32_21 = arith.constant 0 : i32
    %32 = arith.cmpi ne, %31, %c0_i32_21 : i32
    scf.if %32 {
      %c0_22 = arith.constant 0 : index
      %c0_23 = arith.constant 0 : index
      %33 = vector.load %arg6[%c0_22, %c0_23] : memref<2x1xf32, #tpu.memory_space<vmem>>, vector<2x1xf32>
      %cst_24 = arith.constant 1.562500e-02 : f32
      %34 = vector.broadcast %cst_24 : f32 to vector<2x1xf32>
      %35 = arith.mulf %33, %34 : vector<2x1xf32>
      %c0_25 = arith.constant 0 : index
      %c0_26 = arith.constant 0 : index
      %36 = vector.load %arg5[%c0_25, %c0_26] : memref<2x64xf32, #tpu.memory_space<vmem>>, vector<2x64xf32>
      %37 = arith.addf %36, %6 : vector<2x64xf32>
      %cst_27 = arith.constant 0.000000e+00 : f32
      %38 = vector.broadcast %cst_27 : f32 to vector<2x64xf32>
      %39 = arith.maximumf %37, %38 : vector<2x64xf32>
      %cst_28 = arith.constant dense<0.000000e+00> : vector<2xf32>
      %40 = vector.multi_reduction <add>, %39, %cst_28 [1] : vector<2x64xf32> to vector<2xf32>
      %41 = vector.shape_cast %40 : vector<2xf32> to vector<2x1xf32>
      %cst_29 = arith.constant 1.562500e-02 : f32
      %42 = vector.broadcast %cst_29 : f32 to vector<2x1xf32>
      %43 = arith.mulf %41, %42 : vector<2x1xf32>
      %44 = arith.addf %35, %43 : vector<2x1xf32>
      %cst_30 = arith.constant 5.000000e-01 : f32
      %45 = vector.broadcast %cst_30 : f32 to vector<2x1xf32>
      %46 = arith.mulf %45, %44 : vector<2x1xf32>
      %47 = vector.shape_cast %46 : vector<2x1xf32> to vector<1x2x1xf32>
      %c0_31 = arith.constant 0 : index
      %c0_32 = arith.constant 0 : index
      %c0_33 = arith.constant 0 : index
      %48 = vector.load %arg4[%c0_31, %c0_32, %c0_33] : memref<1x2x1xf32, #tpu.memory_space<vmem>>, vector<1x2x1xf32>
      tpu.vector_store %arg4[%c0_31, %c0_32, %c0_33], %47 {strides = array<i32>} : memref<1x2x1xf32, #tpu.memory_space<vmem>>, vector<1x2x1xf32>,
    } else {
    }
    return
  }
  func.func @transform_0(%arg0: i32, %arg1: i32) -> (i32, i32, i32) {
    %c0_i32 = arith.constant 0 : i32
    %c0_i32_0 = arith.constant 0 : i32
    %c0_i32_1 = arith.constant 0 : i32
    return %arg0, %c0_i32, %c0_i32_0 : i32, i32, i32
  }
  func.func @transform_1(%arg0: i32, %arg1: i32) -> (i32, i32, i32) {
    %c0_i32 = arith.constant 0 : i32
    %c0_i32_0 = arith.constant 0 : i32
    return %arg0, %arg1, %c0_i32 : i32, i32, i32
  }
  func.func @transform_2(%arg0: i32, %arg1: i32) -> (i32, i32, i32) {
    %c0_i32 = arith.constant 0 : i32
    %c0_i32_0 = arith.constant 0 : i32
    %c0_i32_1 = arith.constant 0 : i32
    return %arg0, %c0_i32, %c0_i32_0 : i32, i32, i32
  }
}

</mosaic_0001>

<bundles_post_ra>
// kernel: tpu_custom_call.1
= control target key start
LH: loop header
LB: loop body
LE: loop exit
PB: predicated region body
PF: predicated region fallthrough
CT: control target
= control target key end

     0   :  { %vm70_vm0 = vcmask 64512   ;;  %vm39_vm1 = vcmask 523264   ;;  %vm15_vm2 = vcmask 517120   ;;  %vm1126_vm3 = vcmask 1041409   ;;  %s1823_s0 = inlined_call_operand.vmem [shape: f32[2,8,64], index: 0, kind: input, shape index: {}]   ;;  %s1824_s1 = inlined_call_operand.vmem [shape: f32[2,64,8], index: 1, kind: input, shape index: {}]   ;;  %s1825_s2 = inlined_call_operand.vmem [shape: f32[1,2,1], index: 2, kind: output, shape index: {}]  }
   0x1   :  { %v1188_v0 = vld [vmem:[%s1823_s0] sm:$0xff]  ;;  %v1193_v1 = vld [vmem:[%s1823_s0 + $0x8] sm:$0xff]  ;;  %v1211_v6 = vld [vmem:[%s1824_s1 + $0x10] sm:$0xff]  ;;  %vm1085_vm4 = vcmask 130112   ;;  %vm1089_vm5 = vcmask 195712   ;;  %vm1093_vm6 = vcmask 261312  }
   0x2   :  { %v1198_v2 = vld [vmem:[%s1824_s1] sm:$0xff]  ;;  %v174_v3 = vand.u32 4294901760, %v1188_v0  ;;  %v1206_v5 = vld [vmem:[%s1824_s1 + $0x8] sm:$0xff]  ;;  %v561_v7 = vand.u32 4294901760, %v1193_v1  ;;  %v121_v11 = vadd.f32 %v1211_v6, %v1211_v6  ;;  %v1231_v23 = vld [vmem:[%s1824_s1 + $0x18] sm:$0xff]  ;;  %vm1097_vm7 = vcmask 326912  }
   0x3   :  { %v119_v4 = vadd.f32 %v1198_v2, %v1198_v2  ;;  %v120_v8 = vadd.f32 %v1206_v5, %v1206_v5  ;;  %v122_v30 = vadd.f32 %v1231_v23, %v1231_v23  ;;  %v1244_v35 = vld [vmem:[%s1824_s1 + $0x20] sm:$0xff]  ;;  %v1256_v43 = vld [vmem:[%s1824_s1 + $0x28] sm:$0xff]  ;;  %v1268_v51 = vld [vmem:[%s1824_s1 + $0x30] sm:$0xff]  ;;  %vm1101_vm8 = vcmask 392512  }
   0x4   :  { %v257_v9 = vsub.f32 %v1188_v0, %v174_v3  ;;  %370 = vmatpush.msra.mxu3 %v174_v3  ;;  %175 = vmatpush.msra.mxu0 %v174_v3  ;;  %v644_v13 = vsub.f32 %v1193_v1, %v561_v7  ;;  %v142_v20 = vsel %vm70_vm0, %v121_v11, 0  ;;  %v123_v39 = vadd.f32 %v1244_v35, %v1244_v35  ;;  %v1280_v59 = vld [vmem:[%s1824_s1 + $0x38] sm:$0xff]  ;;  %v29_v63 = vld [vmem:[%s1824_s1 + $0x40] sm:$0xff] }
   0x5   :  { %v136_v10 = vsel %vm70_vm0, %v119_v4, 0  ;;  %v139_v15 = vsel %vm70_vm0, %v120_v8, 0  ;;  %v1234_v28 = vand.u32 4294901760, %v142_v20  ;;  %v145_v34 = vsel %vm70_vm0, %v122_v30, 0 }
   0x6   :  { %v1220_v12 = vand.u32 4294901760, %v136_v10  ;;  %312 = vmatpush.msra.mxu2 %v257_v9  ;;  %v258_v14 = vand.u32 4294901760, %v257_v9  ;;  %v645_v17 = vand.u32 4294901760, %v644_v13  ;;  %v1225_v19 = vand.u32 4294901760, %v139_v15 }
   0x7   :  { %v193_v33 = vsub.f32 %v142_v20, %v1234_v28  ;;  %v1246_v38 = vand.u32 4294901760, %v145_v34  ;;  %v148_v42 = vsel %vm70_vm0, %v123_v39, 0  ;;  %v124_v47 = vadd.f32 %v1256_v43, %v1256_v43 }
   0x8   :  { %v177_v16 = vsub.f32 %v136_v10, %v1220_v12  ;;  %562 = vmatpush.msrb.mxu2 %v561_v7  ;;  %v259_v18 = vsub.f32 %v257_v9, %v258_v14  ;;  %438 = vmatpush.msrb.mxu0 %v258_v14  ;;  %v646_v22 = vsub.f32 %v644_v13, %v645_v17  ;;  %v1258_v46 = vand.u32 4294901760, %v148_v42 }
   0x9   :  { %v185_v25 = vsub.f32 %v139_v15, %v1225_v19  ;;  %v194_v37 = vand.u32 4294901760, %v193_v33  ;;  %v201_v41 = vsub.f32 %v145_v34, %v1246_v38  ;;  %v151_v50 = vsel %vm70_vm0, %v124_v47, 0  ;;  %v30_v15 = vld [vmem:[%s1824_s1 + $0x48] sm:$0xff] }
   0xa   :  { %315 = vmatmul.f32.vlgmr.msra.gmra.mxu2 %v177_v16  ;;  %v178_v21 = vand.u32 4294901760, %v177_v16  ;;  %v260_v24 = vand.u32 4294901760, %v259_v18  ;;  %v647_v27 = vand.u32 4294901760, %v646_v22  ;;  %v209_v49 = vsub.f32 %v148_v42, %v1258_v46 }
   0xb   :  { %825 = vmatpush.msra.mxu2 %v645_v17  ;;  %v186_v29 = vand.u32 4294901760, %v185_v25  ;;  %v195_v40 = vsub.f32 %v193_v33, %v194_v37  ;;  %v202_v45 = vand.u32 4294901760, %v201_v41  ;;  %v1270_v54 = vand.u32 4294901760, %v151_v50 }
   0xc   :  { %374 = vmatmul.f32.vlgmr.msra.gmra.mxu3 %v178_v21  ;;  %v179_v26 = vsub.f32 %v177_v16, %v178_v21  ;;  %261 = vmatpush.msra.mxu1 %v260_v24  ;;  %v210_v53 = vand.u32 4294901760, %v209_v49  ;;  %v125_v55 = vadd.f32 %v1268_v51, %v1268_v51  ;;  %v127_v4 = vadd.f32 %v29_v63, %v29_v63 }
   0xd   :  { %263 = vmatmul.f32.vlgmr.msra.gmra.mxu1 %v1220_v12  ;;  %648 = vmatpush.msrb.mxu3 %v647_v27  ;;  %v187_v32 = vsub.f32 %v185_v25, %v186_v29  ;;  %v196_v44 = vand.u32 4294901760, %v195_v40  ;;  %v203_v48 = vsub.f32 %v201_v41, %v202_v45  ;;  %v217_v57 = vsub.f32 %v151_v50, %v1270_v54 }
   0xe   :  { %v180_v31 = vand.u32 4294901760, %v179_v26  ;;  %488 = vmatpush.msrb.mxu1 %v174_v3  ;;  %v211_v56 = vsub.f32 %v209_v49, %v210_v53  ;;  %v154_v58 = vsel %vm70_vm0, %v125_v55, 0  ;;  %v126_v3 = vadd.f32 %v1280_v59, %v1280_v59 }
   0xf   :  { %875 = vmatpush.msra.mxu3 %v561_v7  ;;  %v188_v36 = vand.u32 4294901760, %v187_v32  ;;  %v204_v52 = vand.u32 4294901760, %v203_v48  ;;  %v218_v61 = vand.u32 4294901760, %v217_v57  ;;  %v1282_v62 = vand.u32 4294901760, %v154_v58 }
  0x10   :  { %181 = vmatmul.f32.vlgmr.msra.gmra.mxu0 %v180_v31  ;;  %757 = vmatpush.msra.mxu1 %v561_v7  ;;  %v212_v60 = vand.u32 4294901760, %v211_v56  ;;  %v157_v9 = vsel %vm70_vm0, %v126_v3, 0  ;;  %v523_v10 = vsel %vm70_vm0, %v127_v4, 0  ;;  %v128_v17 = vadd.f32 %v30_v15, %v30_v15 }
  0x11   :  { %699 = vmatpush.msra.mxu0 %v644_v13  ;;  %v219_v7 = vsub.f32 %v217_v57, %v218_v61  ;;  %v225_v8 = vsub.f32 %v154_v58, %v1282_v62  ;;  %v1293_v14 = vand.u32 4294901760, %v157_v9  ;;  %v1299_v16 = vand.u32 4294901760, %v523_v10 }
  0x12   :  { %320 = vmatmul.f32.gmra.mxu2 %v185_v25  ;;  %v54_v21 = vmul.f32 %v1198_v2, %v1198_v2  ;;  %v526_v25 = vsel %vm70_vm0, %v128_v17, 0  ;;  %v62_v47 = vmul.f32 %v29_v63, %v29_v63  ;;  %v56_v48 = vmul.f32 %v1211_v6, %v1211_v6  ;;  %v1348_v6 = vld [vmem:[%s1824_s1 + $0x60] sm:$0xff] }
  0x13   :  { %v220_v11 = vand.u32 4294901760, %v219_v7  ;;  %v226_v13 = vand.u32 4294901760, %v225_v8  ;;  %v233_v20 = vsub.f32 %v157_v9, %v1293_v14  ;;  %v1305_v22 = vsub.f32 %v523_v10, %v1299_v16 }
  0x14   :  { %380 = vmatmul.f32.gmra.mxu3 %v186_v29  ;;  %v71_v24 = vsel %vm70_vm0, %v54_v21, 0.0  ;;  %v31_v29 = vld [vmem:[%s1824_s1 + $0x50] sm:$0xff]  ;;  %v1314_v30 = vand.u32 4294901760, %v526_v25  ;;  %v57_v63 = vmul.f32 %v1231_v23, %v1231_v23  ;;  %vm1105_vm9 = vcmask 458112  }
  0x15   :  { %267 = vmatmul.f32.gmra.mxu1 %v1225_v19  ;;  %v227_v18 = vsub.f32 %v225_v8, %v226_v13  ;;  %72 = vadd.xlane.f32.xlu0 %v71_v24  ;;  %v234_v27 = vand.u32 4294901760, %v233_v20  ;;  %v565_v2 = vand.u32 4294901760, %v1305_v22  ;;  %v129_v31 = vadd.f32 %v31_v29, %v31_v29 }
  0x16   :  { %v64_v17 = vmul.f32 %v31_v29, %v31_v29  ;;  %vm17_vm10 = vcmask 1024   ;;  %vm1109_vm11 = vcmask 523712  }
  0x17   :  { %v228_v26 = vand.u32 4294901760, %v227_v18  ;;  %v235_v32 = vsub.f32 %v233_v20, %v234_v27  ;;  %v566_v34 = vsub.f32 %v1305_v22, %v565_v2  ;;  %v529_v39 = vsel %vm70_vm0, %v129_v31, 0 }
  0x18   :  { %189 = vmatmul.f32.gmra.mxu0 %v188_v36  ;;  %v1322_v36 = vsub.f32 %v526_v25, %v1314_v30  ;;  %v101_v24 = vsel %vm70_vm0, %v64_v17, 0.0 }
  0x19   :  { %v236_v40 = vand.u32 4294901760, %v235_v32  ;;  %v59_v32 = vmul.f32 %v1256_v43, %v1256_v43 }
  0x1a   :  { %325 = vmatmul.f32.gmra.mxu2 %v193_v33  ;;  %v55_v33 = vmul.f32 %v1206_v5, %v1206_v5  ;;  %v567_v5 = vand.u32 4294901760, %v566_v34  ;;  %v573_v42 = vand.u32 4294901760, %v1322_v36 }
  0x1c   :  { %386 = vmatmul.f32.gmra.mxu3 %v194_v37  ;;  %v74_v37 = vsel %vm70_vm0, %v55_v33, 0.0 }
  0x1d   :  { %271 = vmatmul.f32.gmra.mxu1 %v1234_v28  ;;  %75 = vadd.xlane.f32.xlu0 %v74_v37 }
  0x20   :  { %197 = vmatmul.f32.gmra.mxu0 %v196_v44  ;;  %v1331_v44 = vand.u32 4294901760, %v529_v39 }
  0x22   :  { %330 = vmatmul.f32.gmra.mxu2 %v201_v41  ;;  %v32_v41 = vld [vmem:[%s1824_s1 + $0x58] sm:$0xff]  ;;  %v1339_v50 = vsub.f32 %v529_v39, %v1331_v44  ;;  %v86_v39 = vsel %vm70_vm0, %v59_v32, 0.0 }
  0x23   :  { %v65_v31 = vmul.f32 %v32_v41, %v32_v41 }
  0x24   :  { %392 = vmatmul.f32.gmra.mxu3 %v202_v45  ;;  %v130_v45 = vadd.f32 %v32_v41, %v32_v41 }
  0x25   :  { %275 = vmatmul.f32.gmra.mxu1 %v1246_v38  ;;  %102 = vadd.xlane.f32.xlu0 %v101_v24  ;;  %v104_v37 = vsel %vm70_vm0, %v65_v31, 0.0 }
  0x26   :  { %v532_v55 = vsel %vm70_vm0, %v130_v45, 0 }
  0x27   :  { %v1352_v58 = vand.u32 4294901760, %v532_v55 }
  0x28   :  { %205 = vmatmul.f32.gmra.mxu0 %v204_v52  ;;  %v95_v52 = vsel %vm70_vm0, %v62_v47, 0.0 }
  0x29   :  { %96 = vadd.xlane.f32.xlu2 %v95_v52  ;;  %v1363_v4 = vsub.f32 %v532_v55, %v1352_v58  ;;  %v66_v52 = vmul.f32 %v1348_v6, %v1348_v6 }
  0x2a   :  { %335 = vmatmul.f32.gmra.mxu2 %v209_v49  ;;  %v574_v49 = vsub.f32 %v1322_v36, %v573_v42 }
  0x2b   :  { %v589_v10 = vand.u32 4294901760, %v1363_v4 }
  0x2c   :  { %398 = vmatmul.f32.gmra.mxu3 %v210_v53  ;;  %v77_v53 = vsel %vm70_vm0, %v56_v48, 0.0  ;;  %v575_v56 = vand.u32 4294901760, %v574_v49 }
  0x2d   :  { %279 = vmatmul.f32.gmra.mxu1 %v1258_v46  ;;  %78 = vadd.xlane.f32.xlu1 %v77_v53  ;;  %v590_v18 = vsub.f32 %v1363_v4, %v589_v10  ;;  %v60_v53 = vmul.f32 %v1268_v51, %v1268_v51 }
  0x2e   :  { %87 = vadd.xlane.f32.xlu0 %v86_v39 }
  0x2f   :  { %v89_v55 = vsel %vm70_vm0, %v60_v53, 0.0 }
  0x30   :  { %213 = vmatmul.f32.gmra.mxu0 %v212_v60  ;;  %v131_v60 = vadd.f32 %v1348_v6, %v1348_v6 }
  0x32   :  { %340 = vmatmul.f32.gmra.mxu2 %v217_v57  ;;  %v581_v57 = vand.u32 4294901760, %v1339_v50  ;;  %v535_v9 = vsel %vm70_vm0, %v131_v60, 0 }
  0x34   :  { %404 = vmatmul.f32.gmra.mxu3 %v218_v61  ;;  %v63_v61 = vmul.f32 %v30_v15, %v30_v15  ;;  %v582_v3 = vsub.f32 %v1339_v50, %v581_v57  ;;  %v58_v15 = vmul.f32 %v1244_v35, %v1244_v35  ;;  %v591_v35 = vand.u32 4294901760, %v590_v18 }
  0x35   :  { %283 = vmatmul.f32.gmra.mxu1 %v1270_v54 }
  0x36   :  { %v98_v7 = vsel %vm70_vm0, %v63_v61, 0.0  ;;  %v583_v23 = vand.u32 4294901760, %v582_v3  ;;  %v83_v21 = vsel %vm70_vm0, %v58_v15, 0.0  ;;  %90 = vadd.xlane.f32.xlu0 %v89_v55 }
  0x37   :  { %99 = vadd.xlane.f32.xlu2 %v98_v7 }
  0x38   :  { %221 = vmatmul.f32.gmra.mxu0 %v220_v11  ;;  %v1376_v11 = vand.u32 4294901760, %v535_v9 }
  0x3a   :  { %345 = vmatmul.f32.gmra.mxu2 %v225_v8  ;;  %v80_v8 = vsel %vm70_vm0, %v57_v63, 0.0  ;;  %v61_v63 = vmul.f32 %v1280_v59, %v1280_v59 }
  0x3b   :  { %81 = vadd.xlane.f32.xlu1 %v80_v8 }
  0x3c   :  { %410 = vmatmul.f32.gmra.mxu3 %v226_v13  ;;  %v92_v3 = vsel %vm70_vm0, %v61_v63, 0.0 }
  0x3d   :  { %287 = vmatmul.f32.gmra.mxu1 %v1282_v62 }
  0x3f   :  { %84 = vadd.xlane.f32.xlu2 %v83_v21 }
  0x40   :  { %229 = vmatmul.f32.gmra.mxu0 %v228_v26 }
  0x42   :  { %350 = vmatmul.f32.gmra.mxu2 %v233_v20  ;;  %v1387_v20 = vsub.f32 %v535_v9, %v1376_v11 }
  0x43   :  { %105 = vadd.xlane.f32.xlu1 %v104_v37 }
  0x44   :  { %416 = vmatmul.f32.gmra.mxu3 %v234_v27  ;;  %v597_v26 = vand.u32 4294901760, %v1387_v20 }
  0x45   :  { %291 = vmatmul.f32.gmra.mxu1 %v1293_v14 }
  0x46   :  { %v598_v33 = vsub.f32 %v1387_v20, %v597_v26 }
  0x48   :  { %237 = vmatmul.f32.gmra.mxu0 %v236_v40  ;;  %v599_v43 = vand.u32 4294901760, %v598_v33 }
  0x4a   :  { %568 = vmatmul.f32.vlgmr.msrb.gmra.mxu2 %v567_v5 }
  0x4c   :  { %650 = vmatmul.f32.vlgmr.msrb.gmra.mxu3 %v1299_v16 }
  0x4d   :  { %490 = vmatmul.f32.vlgmr.msrb.gmra.mxu1 %v1220_v12 }
  0x50   :  { %440 = vmatmul.f32.vlgmr.msrb.gmra.mxu0 %v1220_v12  ;;  %v1372_v12 = vld [vmem:[%s1824_s1 + $0x68] sm:$0xff] }
  0x51   :  { %v132_v13 = vadd.f32 %v1372_v12, %v1372_v12 }
  0x52   :  { %576 = vmatmul.f32.gmra.mxu2 %v575_v56 }
  0x53   :  { %v538_v25 = vsel %vm70_vm0, %v132_v13, 0 }
  0x54   :  { %654 = vmatmul.f32.gmra.mxu3 %v1314_v30  ;;  %v1400_v27 = vand.u32 4294901760, %v538_v25 }
  0x55   :  { %494 = vmatmul.f32.gmra.mxu1 %v1225_v19 }
  0x56   :  { %v1411_v34 = vsub.f32 %v538_v25, %v1400_v27 }
  0x58   :  { %444 = vmatmul.f32.gmra.mxu0 %v1225_v19  ;;  %v1396_v19 = vld [vmem:[%s1824_s1 + $0x70] sm:$0xff]  ;;  %v605_v41 = vand.u32 4294901760, %v1411_v34 }
  0x59   :  { %v133_v29 = vadd.f32 %v1396_v19, %v1396_v19 }
  0x5a   :  { %584 = vmatmul.f32.gmra.mxu2 %v583_v23  ;;  %v606_v47 = vsub.f32 %v1411_v34, %v605_v41 }
  0x5b   :  { %v541_v40 = vsel %vm70_vm0, %v133_v29, 0 }
  0x5c   :  { %658 = vmatmul.f32.gmra.mxu3 %v1331_v44  ;;  %v1424_v5 = vand.u32 4294901760, %v541_v40  ;;  %v607_v56 = vand.u32 4294901760, %v606_v47 }
  0x5d   :  { %498 = vmatmul.f32.gmra.mxu1 %v1234_v28 }
  0x5e   :  { %v1433_v48 = vsub.f32 %v541_v40, %v1424_v5 }
  0x60   :  { %448 = vmatmul.f32.gmra.mxu0 %v1234_v28  ;;  %v1420_v28 = vld [vmem:[%s1824_s1 + $0x78] sm:$0xff]  ;;  %v613_v60 = vand.u32 4294901760, %v1433_v48 }
  0x61   :  { %v134_v45 = vadd.f32 %v1420_v28, %v1420_v28  ;;  %v69_v29 = vmul.f32 %v1420_v28, %v1420_v28 }
  0x62   :  { %592 = vmatmul.f32.gmra.mxu2 %v591_v35  ;;  %v614_v51 = vsub.f32 %v1433_v48, %v613_v60 }
  0x63   :  { %v544_v49 = vsel %vm70_vm0, %v134_v45, 0 }
  0x64   :  { %662 = vmatmul.f32.gmra.mxu3 %v1352_v58  ;;  %v1445_v61 = vand.u32 4294901760, %v544_v49  ;;  %v615_v7 = vand.u32 4294901760, %v614_v51 }
  0x65   :  { %502 = vmatmul.f32.gmra.mxu1 %v1246_v38 }
  0x66   :  { %v1452_v6 = vsub.f32 %v544_v49, %v1445_v61 }
  0x68   :  { %452 = vmatmul.f32.gmra.mxu0 %v1246_v38  ;;  %v107_v38 = vsel %vm70_vm0, %v66_v52, 0.0 }
  0x69   :  { %108 = vadd.xlane.f32.xlu1 %v107_v38 }
  0x6a   :  { %600 = vmatmul.f32.gmra.mxu2 %v599_v43 }
  0x6c   :  { %666 = vmatmul.f32.gmra.mxu3 %v1376_v11 }
  0x6d   :  { %506 = vmatmul.f32.gmra.mxu1 %v1258_v46 }
  0x70   :  { %456 = vmatmul.f32.gmra.mxu0 %v1258_v46  ;;  %v621_v46 = vand.u32 4294901760, %v1452_v6 }
  0x71   :  { %93 = vadd.xlane.f32.xlu1 %v92_v3 }
  0x72   :  { %608 = vmatmul.f32.gmra.mxu2 %v607_v56  ;;  %v622_v8 = vsub.f32 %v1452_v6, %v621_v46 }
  0x74   :  { %670 = vmatmul.f32.gmra.mxu3 %v1400_v27  ;;  %v623_v59 = vand.u32 4294901760, %v622_v8 }
  0x75   :  { %510 = vmatmul.f32.gmra.mxu1 %v1270_v54 }
  0x78   :  { %460 = vmatmul.f32.gmra.mxu0 %v1270_v54 }
  0x7a   :  { %616 = vmatmul.f32.gmra.mxu2 %v615_v7 }
  0x7c   :  { %674 = vmatmul.f32.gmra.mxu3 %v1424_v5 }
  0x7d   :  { %514 = vmatmul.f32.gmra.mxu1 %v1282_v62 }
  0x80   :  { %464 = vmatmul.f32.gmra.mxu0 %v1282_v62 }
  0x82   :  { %624 = vmatmul.f32.gmra.mxu2 %v623_v59 }
  0x84   :  { %678 = vmatmul.f32.gmra.mxu3 %v1445_v61 }
  0x85   :  { %518 = vmatmul.f32.gmra.mxu1 %v1293_v14 }
  0x88   :  { %468 = vmatmul.f32.gmra.mxu0 %v1293_v14 }
  0x8a   :  { %827 = vmatmul.f32.vlgmr.msra.gmra.mxu2 %v1299_v16  ;;  %v1471_v54 = vpop.f32.mrf.mxu1 }
  0x8c   :  { %877 = vmatmul.f32.vlgmr.msra.gmra.mxu3 %v1299_v16 }
  0x8d   :  { %v1474_v9 = vpop.f32.mrf.mxu0  ;;  %v1476_v23 = vpop.f32.mrf.mxu2  ;;  %761 = vmatmul.f32.vlgmr.msra.gmra.mxu1 %v565_v2 }
  0x8e   :  { %v265_v28 = vadd.f32 %v1471_v54, %v1474_v9 }
  0x8f   :  { %v1480_v62 = vpop.f32.mrf.mxu3 }
  0x90   :  { %702 = vmatmul.f32.vlgmr.msra.gmra.mxu0 %v1305_v22  ;;  %v317_v49 = vadd.f32 %v1476_v23, %v265_v28 }
  0x92   :  { %831 = vmatmul.f32.gmra.mxu2 %v1314_v30  ;;  %v1484_v14 = vpop.f32.mrf.mxu1  ;;  %v376_v55 = vadd.f32 %v1480_v62, %v317_v49 }
  0x94   :  { %881 = vmatmul.f32.gmra.mxu3 %v1314_v30 }
  0x95   :  { %v1487_v13 = vpop.f32.mrf.mxu0  ;;  %v1489_v16 = vpop.f32.mrf.mxu2  ;;  %767 = vmatmul.f32.gmra.mxu1 %v573_v42 }
  0x96   :  { %v269_v56 = vadd.f32 %v1484_v14, %v1487_v13 }
  0x97   :  { %v1493_v15 = vpop.f32.mrf.mxu3 }
  0x98   :  { %707 = vmatmul.f32.gmra.mxu0 %v1322_v36  ;;  %v322_v7 = vadd.f32 %v1489_v16, %v269_v56 }
  0x9a   :  { %835 = vmatmul.f32.gmra.mxu2 %v1331_v44  ;;  %v1497_v22 = vpop.f32.mrf.mxu1  ;;  %v382_v59 = vadd.f32 %v1493_v15, %v322_v7 }
  0x9c   :  { %885 = vmatmul.f32.gmra.mxu3 %v1331_v44  ;;  %v1606_v15 = vpop.xlane.xlu2 %96 }
  0x9d   :  { %v1500_v2 = vpop.f32.mrf.mxu0  ;;  %v1502_v30 = vpop.f32.mrf.mxu2  ;;  %773 = vmatmul.f32.gmra.mxu1 %v581_v57  ;;  %v67_v57 = vmul.f32 %v1372_v12, %v1372_v12 }
  0x9e   :  { %v273_v54 = vadd.f32 %v1497_v22, %v1500_v2 }
  0x9f   :  { %v1506_v17 = vpop.f32.mrf.mxu3 }
  0xa0   :  { %712 = vmatmul.f32.gmra.mxu0 %v1339_v50  ;;  %v110_v50 = vsel %vm70_vm0, %v67_v57, 0.0  ;;  %v327_v16 = vadd.f32 %v1502_v30, %v273_v54  ;;  %v1603_v57 = vpop.xlane.xlu0 %72 }
  0xa1   :  { %111 = vadd.xlane.f32.xlu2 %v110_v50 }
  0xa2   :  { %839 = vmatmul.f32.gmra.mxu2 %v1352_v58  ;;  %v1510_v36 = vpop.f32.mrf.mxu1  ;;  %v388_v22 = vadd.f32 %v1506_v17, %v327_v16 }
  0xa4   :  { %889 = vmatmul.f32.gmra.mxu3 %v1352_v58 }
  0xa5   :  { %v1513_v42 = vpop.f32.mrf.mxu0  ;;  %v1515_v44 = vpop.f32.mrf.mxu2  ;;  %779 = vmatmul.f32.gmra.mxu1 %v589_v10 }
  0xa6   :  { %v277_v2 = vadd.f32 %v1510_v36, %v1513_v42 }
  0xa7   :  { %v1519_v18 = vpop.f32.mrf.mxu3 }
  0xa8   :  { %717 = vmatmul.f32.gmra.mxu0 %v1363_v4  ;;  %v68_v4 = vmul.f32 %v1396_v19, %v1396_v19  ;;  %v1620_v17 = vpop.xlane.xlu0 %75 }
  0xaa   :  { %843 = vmatmul.f32.gmra.mxu2 %v1376_v11  ;;  %v1526_v58 = vpop.f32.mrf.mxu1  ;;  %v113_v12 = vsel %vm70_vm0, %v68_v4, 0.0 }
  0xab   :  { %114 = vadd.xlane.f32.xlu2 %v113_v12 }
  0xac   :  { %893 = vmatmul.f32.gmra.mxu3 %v1376_v11  ;;  %v37_v11 = vmul.f32 %v1188_v0, %v1188_v0  ;;  %v116_v0 = vsel %vm70_vm0, %v69_v29, 0.0 }
  0xad   :  { %v1529_v21 = vpop.f32.mrf.mxu0  ;;  %v1531_v24 = vpop.f32.mrf.mxu2  ;;  %785 = vmatmul.f32.gmra.mxu1 %v597_v26  ;;  %117 = vadd.xlane.f32.xlu0 %v116_v0 }
  0xae   :  { %v281_v28 = vadd.f32 %v1526_v58, %v1529_v21 }
  0xaf   :  { %v1535_v10 = vpop.f32.mrf.mxu3 }
  0xb0   :  { %722 = vmatmul.f32.gmra.mxu0 %v1387_v20  ;;  %v40_v20 = vsel %vm39_vm1, %v37_v11, 0.0  ;;  %v1642_v7 = vpop.xlane.xlu0 %102 }
  0xb1   :  { %v41_v31 = vrot.slane %v40_v20, 4 }
  0xb2   :  { %847 = vmatmul.f32.gmra.mxu2 %v1400_v27  ;;  %v1544_v25 = vpop.f32.mrf.mxu1 }
  0xb3   :  { %v42_v37 = vadd.f32 %v41_v31, %v40_v20  ;;  %v1612_v20 = vpop.xlane.xlu1 %78 }
  0xb4   :  { %897 = vmatmul.f32.gmra.mxu3 %v1400_v27 }
  0xb5   :  { %v1547_v35 = vpop.f32.mrf.mxu0  ;;  %v1549_v26 = vpop.f32.mrf.mxu2  ;;  %791 = vmatmul.f32.gmra.mxu1 %v605_v41 }
  0xb7   :  { %v1554_v19 = vpop.f32.mrf.mxu3 }
  0xb8   :  { %727 = vmatmul.f32.gmra.mxu0 %v1411_v34  ;;  %v43_v34 = vrot.slane %v42_v37, 2 }
  0xba   :  { %851 = vmatmul.f32.gmra.mxu2 %v1424_v5  ;;  %v1561_v27 = vpop.f32.mrf.mxu1 }
  0xbb   :  { %v1635_v58 = vpop.xlane.xlu1 %81 }
  0xbc   :  { %901 = vmatmul.f32.gmra.mxu3 %v1424_v5  ;;  %v44_v5 = vadd.f32 %v43_v34, %v42_v37  ;;  %v332_v37 = vadd.f32 %v1515_v44, %v277_v2 }
  0xbd   :  { %v1564_v32 = vpop.f32.mrf.mxu0  ;;  %v1566_v33 = vpop.f32.mrf.mxu2  ;;  %797 = vmatmul.f32.gmra.mxu1 %v613_v60 }
  0xbe   :  { %v45_v52 = vrot.slane %v44_v5, 1 }
  0xbf   :  { %v1570_v39 = vpop.f32.mrf.mxu3 }
  0xc0   :  { %732 = vmatmul.f32.gmra.mxu0 %v1433_v48  ;;  %v1588_v51 = vadd.f32 %v45_v52, %v44_v5 }
  0xc2   :  { %855 = vmatmul.f32.gmra.mxu2 %v1445_v61  ;;  %v292_v40 = vpop.f32.mrf.mxu1 }
  0xc4   :  { %905 = vmatmul.f32.gmra.mxu3 %v1445_v61 }
  0xc5   :  { %v238_v43 = vpop.f32.mrf.mxu0  ;;  %v351_v41 = vpop.f32.mrf.mxu2  ;;  %803 = vmatmul.f32.gmra.mxu1 %v621_v46 }
  0xc6   :  { %v293_v45 = vadd.f32 %v292_v40, %v238_v43 }
  0xc7   :  { %v417_v47 = vpop.f32.mrf.mxu3 }
  0xc8   :  { %v352_v48 = vadd.f32 %v351_v41, %v293_v45  ;;  %737 = vmatmul.f32.gmra.mxu0 %v1452_v6  ;;  %v394_v41 = vadd.f32 %v1519_v18, %v332_v37 }
  0xca   :  { %v1581_v53 = vadd.f32 %v417_v47, %v352_v48  ;;  %v491_v38 = vpop.f32.mrf.mxu1  ;;  %v1630_v47 = vpop.xlane.xlu2 %99 }
  0xcd   :  { %v441_v60 = vpop.f32.mrf.mxu0  ;;  %v1586_v61 = vpop.f32.mrf.mxu2 }
  0xce   :  { %v442_v63 = vadd.f32 %v441_v60, %v376_v55  ;;  %v337_v55 = vadd.f32 %v1531_v24, %v281_v28  ;;  %v38_v28 = vmul.f32 %v1193_v1, %v1193_v1 }
  0xcf   :  { %v1590_v3 = vpop.f32.mrf.mxu3 }
  0xd0   :  { %v492_v6 = vadd.f32 %v491_v38, %v442_v63 }
  0xd2   :  { %v909_v46 = vsub.f32 %v1588_v51, %v492_v6  ;;  %v495_v8 = vpop.f32.mrf.mxu1  ;;  %v1005_v34 = vsub.f32 %v1603_v57, %v492_v6  ;;  %v400_v6 = vadd.f32 %v1535_v10, %v337_v55 }
  0xd4   :  { %v925_v9 = vsel %vm39_vm1, %v909_v46, inf  ;;  %v1021_v5 = vsel %vm39_vm1, %v1005_v34, inf  ;;  %v1666_v34 = vpop.xlane.xlu0 %87 }
  0xd5   :  { %v445_v23 = vpop.f32.mrf.mxu0  ;;  %926 = vmin.xlane.f32.xlu1 %v925_v9  ;;  %v1598_v62 = vpop.f32.mrf.mxu2 }
  0xd6   :  { %v446_v14 = vadd.f32 %v445_v23, %v382_v59 }
  0xd7   :  { %v1600_v13 = vpop.f32.mrf.mxu3 }
  0xd8   :  { %v496_v50 = vadd.f32 %v495_v8, %v446_v14  ;;  %v285_v8 = vadd.f32 %v1544_v25, %v1547_v35 }
  0xda   :  { %v910_v4 = vsub.f32 %v1588_v51, %v496_v50  ;;  %v499_v12 = vpop.f32.mrf.mxu1  ;;  %v1006_v18 = vsub.f32 %v1620_v17, %v496_v50  ;;  %v1652_v50 = vpop.xlane.xlu2 %84  ;;  %v342_v10 = vadd.f32 %v1549_v26, %v285_v8 }
  0xdc   :  { %v928_v11 = vsel %vm39_vm1, %v910_v4, inf  ;;  %v1022_v24 = vsel %vm39_vm1, %v1006_v18, inf }
  0xdd   :  { %v449_v29 = vpop.f32.mrf.mxu0  ;;  %929 = vmin.xlane.f32.xlu2 %v928_v11  ;;  %v1614_v30 = vpop.f32.mrf.mxu2  ;;  %v406_v11 = vadd.f32 %v1554_v19, %v342_v10 }
  0xde   :  { %v450_v0 = vadd.f32 %v449_v29, %v388_v22  ;;  %v1659_v22 = vpop.xlane.xlu1 %105  ;;  %v289_v29 = vadd.f32 %v1561_v27, %v1564_v32 }
  0xdf   :  { %v1616_v31 = vpop.f32.mrf.mxu3 }
  0xe0   :  { %v500_v40 = vadd.f32 %v499_v12, %v450_v0  ;;  %v347_v19 = vadd.f32 %v1566_v33, %v289_v29 }
  0xe2   :  { %v1007_v36 = vsub.f32 %v1612_v20, %v500_v40  ;;  %v911_v42 = vsub.f32 %v1588_v51, %v500_v40  ;;  %v503_v43 = vpop.f32.mrf.mxu1 }
  0xe4   :  { %v1023_v45 = vsel %vm39_vm1, %v1007_v36, inf  ;;  %v931_v44 = vsel %vm39_vm1, %v911_v42, inf }
  0xe5   :  { %v1024_v49 = vmin.f32 %v1021_v5, %v1023_v45  ;;  %v453_v48 = vpop.f32.mrf.mxu0  ;;  %932 = vmin.xlane.f32.xlu2 %v931_v44  ;;  %v1632_v52 = vpop.f32.mrf.mxu2  ;;  %v47_v5 = vsel %vm39_vm1, %v38_v28, 0.0  ;;  %v412_v44 = vadd.f32 %v1570_v39, %v347_v19 }
  0xe6   :  { %v454_v38 = vadd.f32 %v453_v48, %v394_v41  ;;  %v48_v18 = vrot.slane %v47_v5, 4 }
  0xe7   :  { %v1637_v21 = vpop.f32.mrf.mxu3 }
  0xe8   :  { %v504_v56 = vadd.f32 %v503_v43, %v454_v38  ;;  %v1681_v38 = vpop.xlane.xlu1 %108 }
  0xea   :  { %v1008_v60 = vsub.f32 %v1635_v58, %v504_v56  ;;  %v912_v63 = vsub.f32 %v1588_v51, %v504_v56  ;;  %v507_v46 = vpop.f32.mrf.mxu1 }
  0xec   :  { %v1025_v59 = vsel %vm39_vm1, %v1008_v60, inf  ;;  %v934_v54 = vsel %vm39_vm1, %v912_v63, inf  ;;  %v1685_v60 = vpop.xlane.xlu0 %90 }
  0xed   :  { %v1026_v9 = vmin.f32 %v1022_v24, %v1025_v59  ;;  %v457_v23 = vpop.f32.mrf.mxu0  ;;  %935 = vmin.xlane.f32.xlu1 %v934_v54  ;;  %v1650_v14 = vpop.f32.mrf.mxu2 }
  0xee   :  { %v458_v16 = vadd.f32 %v457_v23, %v400_v6 }
  0xef   :  { %v1654_v4 = vpop.f32.mrf.mxu3 }
  0xf0   :  { %v508_v12 = vadd.f32 %v507_v46, %v458_v16  ;;  %v49_v46 = vadd.f32 %v48_v18, %v47_v5 }
  0xf2   :  { %v1009_v25 = vsub.f32 %v1652_v50, %v508_v12  ;;  %v913_v35 = vsub.f32 %v1588_v51, %v508_v12  ;;  %v511_v2 = vpop.f32.mrf.mxu1  ;;  %v50_v10 = vrot.slane %v49_v46, 2 }
  0xf4   :  { %v1027_v0 = vsel %vm39_vm1, %v1009_v25, inf  ;;  %v937_v37 = vsel %vm39_vm1, %v913_v35, inf  ;;  %v1696_v25 = vpop.xlane.xlu1 %93 }
  0xf5   :  { %v1028_v26 = vmin.f32 %v1024_v49, %v1027_v0  ;;  %v461_v40 = vpop.f32.mrf.mxu0  ;;  %938 = vmin.xlane.f32.xlu0 %v937_v37  ;;  %v1668_v36 = vpop.f32.mrf.mxu2  ;;  %v652_v37 = vadd.f32 %v1590_v3, %v1586_v61 }
  0xf6   :  { %v462_v42 = vadd.f32 %v461_v40, %v406_v11  ;;  %v51_v11 = vadd.f32 %v50_v10, %v49_v46 }
  0xf7   :  { %v1672_v43 = vpop.f32.mrf.mxu3 }
  0xf8   :  { %v512_v27 = vadd.f32 %v511_v2, %v462_v42 }
  0xfa   :  { %v1010_v32 = vsub.f32 %v1666_v34, %v512_v27  ;;  %v914_v41 = vsub.f32 %v1588_v51, %v512_v27  ;;  %v515_v45 = vpop.f32.mrf.mxu1 }
  0xfc   :  { %v1029_v49 = vsel %vm39_vm1, %v1010_v32, inf  ;;  %v940_v48 = vsel %vm39_vm1, %v914_v41, inf }
  0xfd   :  { %v1030_v1 = vmin.f32 %v1026_v9, %v1029_v49  ;;  %v465_v55 = vpop.f32.mrf.mxu0  ;;  %941 = vmin.xlane.f32.xlu2 %v940_v48  ;;  %v1683_v33 = vpop.f32.mrf.mxu2  ;;  %v656_v49 = vadd.f32 %v1600_v13, %v1598_v62 }
  0xfe   :  { %v466_v56 = vadd.f32 %v465_v55, %v412_v44 }
  0xff   :  { %v1687_v63 = vpop.f32.mrf.mxu3 }
 0x100   :  { %v516_v6 = vadd.f32 %v515_v45, %v466_v56 }
 0x102   :  { %v1011_v39 = vsub.f32 %v1685_v60, %v516_v6  ;;  %v915_v8 = vsub.f32 %v1588_v51, %v516_v6  ;;  %v519_v24 = vpop.f32.mrf.mxu1 }
 0x104   :  { %v1031_v59 = vsel %vm39_vm1, %v1011_v39, inf  ;;  %v943_v54 = vsel %vm39_vm1, %v915_v8, inf  ;;  %v660_v8 = vadd.f32 %v1616_v31, %v1614_v30 }
 0x105   :  { %v1032_v9 = vmin.f32 %v1028_v26, %v1031_v59  ;;  %v469_v23 = vpop.f32.mrf.mxu0  ;;  %944 = vmin.xlane.f32.xlu1 %v943_v54  ;;  %v1693_v16 = vpop.f32.mrf.mxu2 }
 0x106   :  { %v470_v12 = vadd.f32 %v469_v23, %v1581_v53  ;;  %v52_v53 = vrot.slane %v51_v11, 1 }
 0x107   :  { %v1698_v35 = vpop.f32.mrf.mxu3 }
 0x108   :  { %v1700_v2 = vadd.f32 %v519_v24, %v470_v12  ;;  %v1709_v5 = vadd.f32 %v52_v53, %v51_v11 }
 0x10a   :  { %v1012_v29 = vsub.f32 %v1696_v25, %v1700_v2  ;;  %v762_v0 = vpop.f32.mrf.mxu1 }
 0x10c   :  { %v1033_v26 = vsel %vm39_vm1, %v1012_v29, inf  ;;  %v664_v29 = vadd.f32 %v1637_v21, %v1632_v52 }
 0x10d   :  { %v1034_v40 = vmin.f32 %v1030_v1, %v1033_v26  ;;  %v703_v42 = vpop.f32.mrf.mxu0  ;;  %v828_v28 = vpop.f32.mrf.mxu2 }
 0x10e   :  { %v704_v19 = vadd.f32 %v703_v42, %v652_v37 }
 0x10f   :  { %v1707_v27 = vmin.f32 %v1032_v9, %v1034_v40  ;;  %v878_v32 = vpop.f32.mrf.mxu3 }
 0x110   :  { %v763_v41 = vadd.f32 %v762_v0, %v704_v19 }
 0x112   :  { %v829_v45 = vadd.f32 %v828_v28, %v763_v41  ;;  %v768_v44 = vpop.f32.mrf.mxu1 }
 0x114   :  { %v1713_v48 = vadd.f32 %v878_v32, %v829_v45  ;;  %v668_v32 = vadd.f32 %v1654_v4, %v1650_v14 }
 0x115   :  { %v708_v61 = vpop.f32.mrf.mxu0  ;;  %v832_v3 = vpop.f32.mrf.mxu2 }
 0x116   :  { %v709_v1 = vadd.f32 %v708_v61, %v656_v49  ;;  %v917_v55 = vsub.f32 %v1709_v5, %v1713_v48 }
 0x117   :  { %v882_v18 = vpop.f32.mrf.mxu3 }
 0x118   :  { %v769_v56 = vadd.f32 %v768_v44, %v709_v1  ;;  %v949_v6 = vsel %vm39_vm1, %v917_v55, inf }
 0x119   :  { %950 = vmin.xlane.f32.xlu0 %v949_v6 }
 0x11a   :  { %v833_v46 = vadd.f32 %v832_v3, %v769_v56  ;;  %v774_v39 = vpop.f32.mrf.mxu1 }
 0x11c   :  { %v1720_v24 = vadd.f32 %v882_v18, %v833_v46  ;;  %v672_v18 = vadd.f32 %v1672_v43, %v1668_v36  ;;  %v676_v36 = vadd.f32 %v1687_v63, %v1683_v33  ;;  %v680_v33 = vadd.f32 %v1698_v35, %v1693_v16 }
 0x11d   :  { %v713_v62 = vpop.f32.mrf.mxu0  ;;  %v836_v13 = vpop.f32.mrf.mxu2 }
 0x11e   :  { %v714_v59 = vadd.f32 %v713_v62, %v660_v8  ;;  %v918_v54 = vsub.f32 %v1709_v5, %v1720_v24 }
 0x11f   :  { %v886_v9 = vpop.f32.mrf.mxu3 }
 0x120   :  { %v775_v23 = vadd.f32 %v774_v39, %v714_v59  ;;  %v952_v10 = vsel %vm39_vm1, %v918_v54, inf  ;;  %v1168_v59 = vmov inf  }
 0x121   :  { %953 = vmin.xlane.f32.xlu1 %v952_v10  ;;  %16 = vst.msk [vmem:[#allocation2] sm:$0x3] %vm15_vm2, %v1168_v59 }
 0x122   :  { %v837_v12 = vadd.f32 %v836_v13, %v775_v23  ;;  %v780_v11 = vpop.f32.mrf.mxu1 }
 0x124   :  { %v1727_v0 = vadd.f32 %v886_v9, %v837_v12  ;;  %v1743_v9 = vpop.xlane.xlu2 %111 }
 0x125   :  { %v718_v30 = vpop.f32.mrf.mxu0  ;;  %v840_v31 = vpop.f32.mrf.mxu2 }
 0x126   :  { %v719_v37 = vadd.f32 %v718_v30, %v664_v29  ;;  %v919_v26 = vsub.f32 %v1709_v5, %v1727_v0 }
 0x127   :  { %v890_v40 = vpop.f32.mrf.mxu3 }
 0x128   :  { %v781_v42 = vadd.f32 %v780_v11, %v719_v37  ;;  %v955_v28 = vsel %vm39_vm1, %v919_v26, inf  ;;  %v916_v26 = vsub.f32 %v1588_v51, %v1700_v2  ;;  %v1014_v2 = vsub.f32 %v1630_v47, %v1720_v24 }
 0x129   :  { %956 = vmin.xlane.f32.xlu0 %v955_v28  ;;  %v1015_v28 = vsub.f32 %v1642_v7, %v1727_v0 }
 0x12a   :  { %v841_v53 = vadd.f32 %v840_v31, %v781_v42  ;;  %v786_v19 = vpop.f32.mrf.mxu1  ;;  %v946_v35 = vsel %vm39_vm1, %v916_v26, inf }
 0x12c   :  { %v891_v41 = vadd.f32 %v890_v40, %v841_v53 }
 0x12d   :  { %v723_v52 = vpop.f32.mrf.mxu0  ;;  %v844_v21 = vpop.f32.mrf.mxu2 }
 0x12e   :  { %v724_v45 = vadd.f32 %v723_v52, %v668_v32  ;;  %v920_v44 = vsub.f32 %v1709_v5, %v891_v41  ;;  %v1016_v53 = vsub.f32 %v1659_v22, %v891_v41  ;;  %v1013_v52 = vsub.f32 %v1606_v15, %v1713_v48 }
 0x12f   :  { %v894_v49 = vpop.f32.mrf.mxu3  ;;  %v1044_v48 = vsel %vm39_vm1, %v1015_v28, inf  ;;  %v1136_v28 = vld [vmem:[#allocation2] sm:$0x3] }
 0x130   :  { %v787_v61 = vadd.f32 %v786_v19, %v724_v45  ;;  %v958_v3 = vsel %vm39_vm1, %v920_v44, inf }
 0x131   :  { %959 = vmin.xlane.f32.xlu2 %v958_v3 }
 0x132   :  { %v845_v1 = vadd.f32 %v844_v21, %v787_v61  ;;  %v792_v55 = vpop.f32.mrf.mxu1  ;;  %v1759_v21 = vpop.xlane.xlu2 %114  ;;  %v1046_v61 = vsel %vm39_vm1, %v1016_v53, inf }
 0x134   :  { %v895_v56 = vadd.f32 %v894_v49, %v845_v1  ;;  %v1036_v1 = vrot.slane %v1707_v27, 4 }
 0x135   :  { %v728_v6 = vpop.f32.mrf.mxu0  ;;  %v848_v46 = vpop.f32.mrf.mxu2 }
 0x136   :  { %v729_v14 = vadd.f32 %v728_v6, %v672_v18  ;;  %v921_v4 = vsub.f32 %v1709_v5, %v895_v56  ;;  %v1017_v45 = vsub.f32 %v1681_v38, %v895_v56  ;;  %v1770_v18 = vpop.xlane.xlu0 %117  ;;  %v1043_v56 = vsel %vm39_vm1, %v1014_v2, inf }
 0x137   :  { %v898_v39 = vpop.f32.mrf.mxu3  ;;  %v1037_v59 = vmin.f32 %v1707_v27, %v1036_v1  ;;  %v1080_v1 = vlaneseq }
 0x138   :  { %v793_v8 = vadd.f32 %v792_v55, %v729_v14  ;;  %v961_v62 = vsel %vm39_vm1, %v921_v4, inf  ;;  %v1042_v55 = vsel %vm39_vm1, %v1013_v52, inf  ;;  %v1048_v6 = vsel %vm39_vm1, %v1017_v45, inf }
 0x139   :  { %962 = vmin.xlane.f32.xlu1 %v961_v62  ;;  %v1045_v4 = vmin.f32 %v1042_v55, %v1044_v48 }
 0x13a   :  { %v849_v13 = vadd.f32 %v848_v46, %v793_v8  ;;  %v798_v54 = vpop.f32.mrf.mxu1 }
 0x13c   :  { %v899_v43 = vadd.f32 %v898_v39, %v849_v13  ;;  %v1047_v39 = vmin.f32 %v1043_v56, %v1046_v61 }
 0x13d   :  { %v733_v23 = vpop.f32.mrf.mxu0  ;;  %v852_v10 = vpop.f32.mrf.mxu2 }
 0x13e   :  { %v734_v12 = vadd.f32 %v733_v23, %v676_v36  ;;  %v922_v11 = vsub.f32 %v1709_v5, %v899_v43  ;;  %v1018_v0 = vsub.f32 %v1743_v9, %v899_v43 }
 0x13f   :  { %v902_v29 = vpop.f32.mrf.mxu3 }
 0x140   :  { %v799_v30 = vadd.f32 %v798_v54, %v734_v12  ;;  %v964_v31 = vsel %vm39_vm1, %v922_v11, inf  ;;  %v1050_v46 = vsel %vm39_vm1, %v1018_v0, inf  ;;  %v1049_v54 = vmin.f32 %v1045_v4, %v1048_v6 }
 0x141   :  { %965 = vmin.xlane.f32.xlu0 %v964_v31  ;;  %v1051_v36 = vmin.f32 %v1047_v39, %v1050_v46  ;;  %v1038_v11 = vrot.slane %v1037_v59, 2  ;;  %v1081_v6 = vand.u32 127, %v1080_v1 }
 0x142   :  { %v853_v37 = vadd.f32 %v852_v10, %v799_v30  ;;  %v804_v42 = vpop.f32.mrf.mxu1 }
 0x143   :  { %v1039_v31 = vmin.f32 %v1037_v59, %v1038_v11  ;;  %v1087_v59 = vadd.s32 4294967280, %v1081_v6 }
 0x144   :  { %v903_v63 = vadd.f32 %v902_v29, %v853_v37 }
 0x145   :  { %v738_v40 = vpop.f32.mrf.mxu0  ;;  %v856_v16 = vpop.f32.mrf.mxu2 }
 0x146   :  { %v739_v19 = vadd.f32 %v738_v40, %v680_v33  ;;  %v923_v32 = vsub.f32 %v1709_v5, %v903_v63  ;;  %v1019_v24 = vsub.f32 %v1759_v21, %v903_v63  ;;  %v1040_v33 = vrot.slane %v1039_v31, 1 }
 0x147   :  { %v906_v49 = vpop.f32.mrf.mxu3 }
 0x148   :  { %v805_v44 = vadd.f32 %v804_v42, %v739_v19  ;;  %v967_v41 = vsel %vm39_vm1, %v923_v32, inf  ;;  %v1052_v8 = vsel %vm39_vm1, %v1019_v24, inf  ;;  %v1041_v27 = vmin.f32 %v1039_v31, %v1040_v33  ;;  %v927_v45 = vpop.xlane.xlu1 %926 }
 0x149   :  { %947 = vmin.xlane.f32.xlu0 %v946_v35  ;;  %968 = vmin.xlane.f32.xlu2 %v967_v41  ;;  %v1053_v10 = vmin.f32 %v1049_v54, %v1052_v8  ;;  %v1151_v32 = vsel %vm1126_vm3, %v1709_v5, %v1588_v51  ;;  %v973_v46 = vadd.f32 %v927_v45, %v1603_v57  ;;  %v1091_v54 = vadd.s32 4294967272, %v1081_v6 }
 0x14a   :  { %v857_v3 = vadd.f32 %v856_v16, %v805_v44  ;;  %v1095_v57 = vadd.s32 4294967264, %v1081_v6 }
 0x14b   :  { %v989_v8 = vmax.f32 %v973_v46, 0.0 }
 0x14c   :  { %v907_v14 = vadd.f32 %v906_v49, %v857_v3 }
 0x14e   :  { %v1020_v62 = vsub.f32 %v1770_v18, %v907_v14  ;;  %v924_v13 = vsub.f32 %v1709_v5, %v907_v14  ;;  %v1083_v14 = vadd.s32 4294967288, %v1081_v6 }
 0x150   :  { %v1054_v43 = vsel %vm39_vm1, %v1020_v62, inf  ;;  %v970_v23 = vsel %vm39_vm1, %v924_v13, inf  ;;  %v930_v0 = vpop.xlane.xlu2 %929 }
 0x151   :  { %v1055_v12 = vmin.f32 %v1051_v36, %v1054_v43  ;;  %971 = vmin.xlane.f32.xlu1 %v970_v23  ;;  %v974_v56 = vadd.f32 %v930_v0, %v1620_v17 }
 0x153   :  { %v1056_v29 = vmin.f32 %v1053_v10, %v1055_v12  ;;  %v990_v4 = vmax.f32 %v974_v56, 0.0  ;;  %v1169_v56 = vmov 0.0  }
 0x154   :  { %18 = vst.msk [vmem:[#allocation3] sm:$0x3] %vm17_vm10, %v1169_v56 }
 0x155   :  { %v1057_v30 = vrot.slane %v1056_v29, 4  ;;  %v1084_v43 = vperm.slane %v990_v4, %v1083_v14 }
 0x157   :  { %v1058_v37 = vmin.f32 %v1056_v29, %v1057_v30 }
 0x158   :  { %v933_v49 = vpop.xlane.xlu2 %932 }
 0x159   :  { %v1059_v26 = vrot.slane %v1058_v37, 2  ;;  %v975_v62 = vadd.f32 %v933_v49, %v1612_v20 }
 0x15b   :  { %v1060_v63 = vmin.f32 %v1058_v37, %v1059_v26  ;;  %v991_v31 = vmax.f32 %v975_v62, 0.0 }
 0x15d   :  { %v1061_v40 = vrot.slane %v1060_v63, 1 }
 0x15f   :  { %v1062_v42 = vmin.f32 %v1060_v63, %v1061_v40 }
 0x160   :  { %v936_v41 = vpop.xlane.xlu1 %935 }
 0x161   :  { %v1139_v53 = vsel %vm1126_vm3, %v1062_v42, %v1041_v27  ;;  %v976_v23 = vadd.f32 %v936_v41, %v1635_v58 }
 0x162   :  { %v1141_v19 = vmin.f32 %v1136_v28, %v1139_v53  ;;  %v1088_v53 = vperm.slane %v991_v31, %v1087_v59 }
 0x163   :  { %v992_v33 = vmax.f32 %v976_v23, 0.0 }
 0x164   :  { %1142 = vst.msk [vmem:[#allocation2] sm:$0x3] %vm15_vm2, %v1141_v19  ;;  %v1103_v19 = vadd.s32 4294967248, %v1081_v6 }
 0x168   :  { %v939_v44 = vpop.xlane.xlu0 %938 }
 0x16b   :  { %v1148_v52 = vld [vmem:[#allocation2] sm:$0x3] }
 0x16c   :  { %v1153_v2 = vadd.f32 %v1151_v32, %v1148_v52 }
 0x16e   :  { %v1154_v16 = vmax.f32 %v1153_v2, 0.0 }
 0x170   :  { %v1155_v35 = vsel %vm15_vm2, %v1154_v16, 0.0  ;;  %v942_v24 = vpop.xlane.xlu2 %941  ;;  %v1092_v16 = vperm.slane %v992_v33, %v1091_v54 }
 0x171   :  { %1156 = vadd.xlane.f32.xlu0 %v1155_v35  ;;  %v978_v12 = vadd.f32 %v942_v24, %v1666_v34  ;;  %v1107_v35 = vadd.s32 4294967240, %v1081_v6 }
 0x173   :  { %v994_v27 = vmax.f32 %v978_v12, 0.0 }
 0x178   :  { %v945_v61 = vpop.xlane.xlu1 %944 }
 0x179   :  { %v979_v58 = vadd.f32 %v945_v61, %v1685_v60 }
 0x17b   :  { %v995_v32 = vmax.f32 %v979_v58, 0.0 }
 0x18c   :  { %v951_v48 = vpop.xlane.xlu0 %950 }
 0x18d   :  { %v981_v36 = vadd.f32 %v951_v48, %v1606_v15  ;;  %v1082_v15 = vperm.slane %v989_v8, %v1081_v6 }
 0x18f   :  { %v1086_v34 = vsel %vm1085_vm4, %v1084_v43, %v1082_v15  ;;  %v1063_v43 = vld [vmem:[#allocation3] sm:$0x3] }
 0x190   :  { %v1090_v24 = vsel %vm1089_vm5, %v1088_v53, %v1086_v34 }
 0x194   :  { %v954_v55 = vpop.xlane.xlu1 %953 }
 0x195   :  { %v982_v39 = vadd.f32 %v954_v55, %v1630_v47  ;;  %v977_v47 = vadd.f32 %v939_v44, %v1652_v50 }
 0x197   :  { %v998_v20 = vmax.f32 %v982_v39, 0.0  ;;  %v993_v40 = vmax.f32 %v977_v47, 0.0 }
 0x199   :  { %v1112_v42 = vperm.slane %v998_v20, %v1083_v14  ;;  %v1096_v0 = vperm.slane %v993_v40, %v1095_v57 }
 0x19c   :  { %v957_v3 = vpop.xlane.xlu0 %956 }
 0x19d   :  { %v983_v17 = vadd.f32 %v957_v3, %v1642_v7  ;;  %v1099_v7 = vadd.s32 4294967256, %v1081_v6  ;;  %v1104_v3 = vperm.slane %v995_v32, %v1103_v19 }
 0x19f   :  { %v999_v26 = vmax.f32 %v983_v17, 0.0  ;;  %v1100_v44 = vperm.slane %v994_v27, %v1099_v7 }
 0x1a1   :  { %v1114_v52 = vperm.slane %v999_v26, %v1087_v59 }
 0x1a4   :  { %v960_v51 = vpop.xlane.xlu2 %959 }
 0x1a5   :  { %v984_v10 = vadd.f32 %v960_v51, %v1659_v22  ;;  %v997_v22 = vmax.f32 %v981_v36, 0.0  ;;  %v1094_v51 = vsel %vm1093_vm6, %v1092_v16, %v1090_v24 }
 0x1a6   :  { %v1098_v14 = vsel %vm1097_vm7, %v1096_v0, %v1094_v51 }
 0x1a7   :  { %v1000_v63 = vmax.f32 %v984_v10, 0.0  ;;  %v1111_v60 = vperm.slane %v997_v22, %v1081_v6  ;;  %v1102_v4 = vsel %vm1101_vm8, %v1100_v44, %v1098_v14 }
 0x1a8   :  { %v1106_v62 = vsel %vm1105_vm9, %v1104_v3, %v1102_v4 }
 0x1ac   :  { %v963_v13 = vpop.xlane.xlu1 %962 }
 0x1ad   :  { %v985_v11 = vadd.f32 %v963_v13, %v1681_v38 }
 0x1af   :  { %v1001_v28 = vmax.f32 %v985_v11, 0.0 }
 0x1b1   :  { %v1118_v41 = vperm.slane %v1001_v28, %v1095_v57 }
 0x1b4   :  { %v966_v5 = vpop.xlane.xlu0 %965 }
 0x1b5   :  { %v986_v37 = vadd.f32 %v966_v5, %v1743_v9 }
 0x1b7   :  { %v1002_v9 = vmax.f32 %v986_v37, 0.0 }
 0x1b9   :  { %v1120_v48 = vperm.slane %v1002_v9, %v1099_v7 }
 0x1bc   :  { %v948_v29 = vpop.xlane.xlu0 %947  ;;  %v969_v30 = vpop.xlane.xlu2 %968 }
 0x1bd   :  { %v987_v50 = vadd.f32 %v969_v30, %v1759_v21  ;;  %v980_v38 = vadd.f32 %v948_v29, %v1696_v25  ;;  %v1116_v21 = vperm.slane %v1000_v63, %v1091_v54  ;;  %v1113_v25 = vsel %vm1085_vm4, %v1112_v42, %v1111_v60 }
 0x1be   :  { %v1115_v1 = vsel %vm1089_vm5, %v1114_v52, %v1113_v25 }
 0x1bf   :  { %v1003_v2 = vmax.f32 %v987_v50, 0.0  ;;  %v996_v45 = vmax.f32 %v980_v38, 0.0  ;;  %v1117_v5 = vsel %vm1093_vm6, %v1116_v21, %v1115_v1 }
 0x1c1   :  { %v1122_v55 = vperm.slane %v1003_v2, %v1103_v19  ;;  %v1108_v6 = vperm.slane %v996_v45, %v1107_v35 }
 0x1c3   :  { %v1110_v59 = vsel %vm1109_vm11, %v1108_v6, %v1106_v62 }
 0x1c4   :  { %v972_v49 = vpop.xlane.xlu1 %971 }
 0x1c5   :  { %v988_v61 = vadd.f32 %v972_v49, %v1770_v18  ;;  %v1119_v18 = vsel %vm1097_vm7, %v1118_v41, %v1117_v5 }
 0x1c6   :  { %v1121_v39 = vsel %vm1101_vm8, %v1120_v48, %v1119_v18 }
 0x1c7   :  { %v1004_v46 = vmax.f32 %v988_v61, 0.0  ;;  %v1123_v13 = vsel %vm1105_vm9, %v1122_v55, %v1121_v39 }
 0x1c9   :  { %v1124_v8 = vperm.slane %v1004_v46, %v1107_v35 }
 0x1cb   :  { %v1125_v54 = vsel %vm1109_vm11, %v1124_v8, %v1123_v13 }
 0x1cc   :  { %v1127_v36 = vsel %vm1126_vm3, %v1125_v54, %v1110_v59 }
 0x1cd   :  { %v1130_v17 = vsel %vm15_vm2, %v1127_v36, 0.0 }
 0x1ce   :  { %1131 = vadd.xlane.f32.xlu2 %v1130_v17 }
 0x1e4   :  { %v1157_v10 = vpop.xlane.xlu0 %1156 }
 0x1e5   :  { %v1158_v12 = vmul.f32 0.015625, %v1157_v10 }
 0x241   :  { %v1132_v23 = vpop.xlane.xlu2 %1131 }
 0x242   :  { %v1133_v57 = vadd.f32 %v1132_v23, %v1063_v43 }
 0x244   :  { %1135 = vst.msk [vmem:[#allocation3] sm:$0x3] %vm17_vm10, %v1133_v57 }
 0x24b   :  { %v1146_v47 = vld [vmem:[#allocation3] sm:$0x3] }
 0x24c   :  { %v1147_v20 = vmul.f32 0.015625, %v1146_v47 }
 0x24e   :  { %v1159_v11 = vadd.f32 %v1158_v12, %v1147_v20 }
 0x250   :  { %v1160_v29 = vmul.f32 0.5, %v1159_v11 }
 0x252   :  { %1161 = vst.msk [vmem:[%s1825_s2] sm:$0x3] %vm17_vm10, %v1160_v29 }

</bundles_post_ra>
